<compile_context>
chip_gen: v6e
topology: v6e:2x2x1
jax: 0.10.0
libtpu: 0.0.40
codegen_flags: <defaults>
</compile_context>

<pallas_src>
import jax
import jax.numpy as jnp
from jax.experimental import pallas as pl
from jax.experimental.pallas import tpu as pltpu

NEG_SLOPE = 0.01  # nn.LeakyReLU() default


def _leaky_relu(v):
    return jnp.where(v > 0, v, NEG_SLOPE * v)


def _round_up(n, m):
    return ((n + m - 1) // m) * m


def simplest_net_kernel(x_ref, w1_ref, b1_ref, w2_ref, b2_ref,
                        w3_r2_ref, w3_r1_ref, b3_ref,
                        wo_ref, bo_ref,
                        y_ref, feat_ref):
    # x arrives f32; cast to bf16 in-kernel (VPU work hidden under the DMA).
    x = x_ref[...].astype(jnp.bfloat16)

    # fc1 -> LeakyReLU
    r1 = _leaky_relu(
        jnp.dot(x, w1_ref[...], preferred_element_type=jnp.float32) + b1_ref[...])
    r1b = r1.astype(jnp.bfloat16)

    # fc2 -> LeakyReLU
    r2 = _leaky_relu(
        jnp.dot(r1b, w2_ref[...], preferred_element_type=jnp.float32) + b2_ref[...])
    r2b = r2.astype(jnp.bfloat16)

    # fc3(cat([r2, r1])) == r2 @ w3[:64] + r1 @ w3[64:96]  (no lane concat here)
    r3 = _leaky_relu(
        jnp.dot(r2b, w3_r2_ref[...], preferred_element_type=jnp.float32)
        + jnp.dot(r1b, w3_r1_ref[...], preferred_element_type=jnp.float32)
        + b3_ref[...])

    # Single concatenate materializes the lane-dense 128-wide feature output
    # and doubles as the K=128 operand for outfc.
    feat = jnp.concatenate([r3, r2, r1], axis=-1)
    feat_ref[...] = feat

    # outfc(cat([r3, r2, r1])) as one K=128 MXU dot.
    y_ref[...] = (
        jnp.dot(feat.astype(jnp.bfloat16), wo_ref[...],
                preferred_element_type=jnp.float32)
        + bo_ref[...])


def simplest_net_forward(x, params, *, tile_b=4096):
    """x: (B, input_window*2) float32. Returns (y, features) in float32."""
    (w1, b1), (w2, b2), (w3, b3), (wo, bo) = params
    B, d_in = x.shape
    h1 = w1.shape[1]          # 32
    h2 = w2.shape[1]          # 64
    h3 = w3.shape[1]          # 32
    d_out = wo.shape[1]
    feat_dim = wo.shape[0]    # 32 + 64 + 32 = 128

    # Batch tiling:
    #  * clamp so padding waste stays under one tile,
    #  * prefer >= 2 grid steps when the batch allows it (v7x megacore),
    #  * multiple of 8 sublanes.
    half_b = _round_up(max(1, (B + 1) // 2), 8)
    tile_b = _round_up(max(8, min(tile_b, half_b)), 8)
    padded_B = _round_up(B, tile_b)
    if padded_B != B:
        x = jnp.pad(x, ((0, padded_B - B), (0, 0)))
    grid = (padded_B // tile_b,)

    bf16 = jnp.bfloat16
    f32 = jnp.float32
    # Host-side K-split of the fc3 weight only (free; avoids in-kernel concat
    # in front of that matmul).  outfc weight stays whole (feat concat reused).
    w3_r2 = w3[:h2].astype(bf16)
    w3_r1 = w3[h2:].astype(bf16)

    args = (x,
            w1.astype(bf16), b1[None, :].astype(f32),
            w2.astype(bf16), b2[None, :].astype(f32),
            w3_r2, w3_r1, b3[None, :].astype(f32),
            wo.astype(bf16), bo[None, :].astype(f32))

    def resident(a):  # weights / biases: same block every grid step (VMEM-resident)
        return pl.BlockSpec(a.shape, lambda i, _nd=a.ndim: (0,) * _nd)

    in_specs = [pl.BlockSpec((tile_b, d_in), lambda i: (i, 0))]
    in_specs += [resident(a) for a in args[1:]]

    out_shape = (jax.ShapeDtypeStruct((padded_B, d_out), f32),
                 jax.ShapeDtypeStruct((padded_B, feat_dim), f32))
    # y intentionally NOT padded to 128 lanes: it is only 64 B/row and padding
    # would add ~448 B/row of writes to a memory-bound kernel.
    out_specs = (pl.BlockSpec((tile_b, d_out), lambda i: (i, 0)),
                 pl.BlockSpec((tile_b, feat_dim), lambda i: (i, 0)))

    # Explicit VMEM budget (~2x the per-step footprint) so larger tiles compile
    # predictably across v5e/v6e/v7x scoped-VMEM defaults (16/32/32 MiB).
    weight_bytes = sum(int(a.size) * a.dtype.itemsize for a in args[1:])
    bytes_per_row = (
        d_in * 4 * 2                 # x input tile (f32), double-buffered
        + d_out * 4 * 2              # y output tile, double-buffered
        + feat_dim * 4 * 2           # feat output tile, double-buffered
        + (h1 + h2 + h3) * 4         # f32 intermediates r1/r2/r3
        + feat_dim * 4               # f32 concat temp
        + (d_in + h1 + h2 + h3 + feat_dim) * 2)   # bf16 copies
    vmem_est = tile_b * bytes_per_row + 2 * weight_bytes
    vmem_limit = int(min(56 * 2**20, max(32 * 2**20, 2 * vmem_est)))

    flops = 2 * padded_B * (d_in * h1 + h1 * h2 + (h1 + h2) * h3
                            + feat_dim * d_out)
    bytes_accessed = (padded_B * (d_in + d_out + feat_dim) * 4) + weight_bytes
    cost = pl.CostEstimate(flops=flops, transcendentals=0,
                           bytes_accessed=bytes_accessed)

    y, feat = pl.pallas_call(
        simplest_net_kernel,
        out_shape=out_shape,
        grid=grid,
        in_specs=in_specs,
        out_specs=out_specs,
        compiler_params=pltpu.CompilerParams(
            dimension_semantics=("parallel",),
            vmem_limit_bytes=vmem_limit),
        cost_estimate=cost,
    )(*args)

    if padded_B != B:
        y, feat = y[:B], feat[:B]
    return y, feat


def init_params(key, input_window, output_window):
    """Deterministic synthetic params with the same shapes as SimplestNet.__init__."""
    d_in = input_window * 2
    d_out = output_window * 2
    dims = [(d_in, 32), (32, 64), (64 + 32, 32), (32 + 32 + 64, d_out)]
    params = []
    for (fan_in, fan_out) in dims:
        key, kw, kb = jax.random.split(key, 3)
        bound = 1.0 / jnp.sqrt(fan_in)
        w = jax.random.uniform(kw, (fan_in, fan_out), jnp.float32, -bound, bound)
        b = jax.random.uniform(kb, (fan_out,), jnp.float32, -bound, bound)
        params.append((w, b))
    return params


def reference_forward(x, params, *, operand_dtype=jnp.float32):
    """Pure-JAX reference. operand_dtype=bfloat16 mirrors the kernel arithmetic."""
    (w1, b1), (w2, b2), (w3, b3), (wo, bo) = params
    h2 = w2.shape[1]
    lr = lambda v: jnp.where(v > 0, v, NEG_SLOPE * v)

    def dot(a, w):
        return jnp.dot(a.astype(operand_dtype), w.astype(operand_dtype),
                       preferred_element_type=jnp.float32)

    r1 = lr(dot(x, w1) + b1)
    r2 = lr(dot(r1, w2) + b2)
    r3 = lr(dot(r2, w3[:h2]) + dot(r1, w3[h2:]) + b3)
    feat = jnp.concatenate([r3, r2, r1], axis=-1)
    y = dot(feat, wo) + bo
    return y, feat


if __name__ == "__main__":
    input_window = 8    # -> fc1 input dim = 16
    output_window = 8   # -> outfc output dim = 16
    batch = 2           # tiny demo batch; wrapper pads to a full sublane tile

    key = jax.random.PRNGKey(0)
    key, kx = jax.random.split(key)
    x = jax.random.normal(kx, (batch, input_window * 2), jnp.float32)
    params = init_params(key, input_window, output_window)

    y, feat = simplest_net_forward(x, params)
    y = jax.block_until_ready(y)
    feat = jax.block_until_ready(feat)

    # Reference matching the kernel arithmetic (bf16 operands, f32 accumulation).
    y_ref, feat_ref = reference_forward(x, params, operand_dtype=jnp.bfloat16)
    assert jnp.allclose(y, y_ref, atol=1e-3, rtol=1e-3)
    assert jnp.allclose(feat, feat_ref, atol=1e-3, rtol=1e-3)

    # Sanity vs pure-f32 math (tolerance covers bf16 operand rounding).
    y32, feat32 = reference_forward(x, params, operand_dtype=jnp.float32)
    assert jnp.allclose(y, y32, atol=5e-2, rtol=5e-2)
    assert jnp.allclose(feat, feat32, atol=5e-2, rtol=5e-2)

    print("KERNEL_OK")
</pallas_src>

<mosaic_0001>
module attributes {stable_mosaic.version = 11 : i64} {
  func.func @simplest_net_kernel(%arg0: i32, %arg1: memref<8x16xf32, #tpu.memory_space<vmem>>, %arg2: memref<16x32xbf16, #tpu.memory_space<vmem>>, %arg3: memref<1x32xf32, #tpu.memory_space<vmem>>, %arg4: memref<32x64xbf16, #tpu.memory_space<vmem>>, %arg5: memref<1x64xf32, #tpu.memory_space<vmem>>, %arg6: memref<64x32xbf16, #tpu.memory_space<vmem>>, %arg7: memref<32x32xbf16, #tpu.memory_space<vmem>>, %arg8: memref<1x32xf32, #tpu.memory_space<vmem>>, %arg9: memref<128x16xbf16, #tpu.memory_space<vmem>>, %arg10: memref<1x16xf32, #tpu.memory_space<vmem>>, %arg11: memref<8x16xf32, #tpu.memory_space<vmem>>, %arg12: memref<8x128xf32, #tpu.memory_space<vmem>>) attributes {dimension_semantics = [#tpu.dimension_semantics<parallel>], iteration_bounds = array<i64: 1>, scalar_prefetch = 0 : i64, scratch_operands = 0 : i64, tpu.core_type = #tpu.core_type<tc>, window_params = [{transform_indices = @transform_0, window_bounds = array<i64: 8, 16>}, {pipeline_mode = #tpu.pipeline_mode<synchronous>, transform_indices = @transform_1, window_bounds = array<i64: 16, 32>}, {pipeline_mode = #tpu.pipeline_mode<synchronous>, transform_indices = @transform_2, window_bounds = array<i64: 1, 32>}, {pipeline_mode = #tpu.pipeline_mode<synchronous>, transform_indices = @transform_3, window_bounds = array<i64: 32, 64>}, {pipeline_mode = #tpu.pipeline_mode<synchronous>, transform_indices = @transform_4, window_bounds = array<i64: 1, 64>}, {pipeline_mode = #tpu.pipeline_mode<synchronous>, transform_indices = @transform_5, window_bounds = array<i64: 64, 32>}, {pipeline_mode = #tpu.pipeline_mode<synchronous>, transform_indices = @transform_6, window_bounds = array<i64: 32, 32>}, {pipeline_mode = #tpu.pipeline_mode<synchronous>, transform_indices = @transform_7, window_bounds = array<i64: 1, 32>}, {pipeline_mode = #tpu.pipeline_mode<synchronous>, transform_indices = @transform_8, window_bounds = array<i64: 128, 16>}, {pipeline_mode = #tpu.pipeline_mode<synchronous>, transform_indices = @transform_9, window_bounds = array<i64: 1, 16>}, {transform_indices = @transform_10, window_bounds = array<i64: 8, 16>}, {transform_indices = @transform_11, window_bounds = array<i64: 8, 128>}]} {
    %c0 = arith.constant 0 : index
    %c0_0 = arith.constant 0 : index
    %0 = vector.load %arg1[%c0, %c0_0] : memref<8x16xf32, #tpu.memory_space<vmem>>, vector<8x16xf32>
    %1 = arith.truncf %0 : vector<8x16xf32> to vector<8x16xbf16>
    %c0_1 = arith.constant 0 : index
    %c0_2 = arith.constant 0 : index
    %2 = vector.load %arg2[%c0_1, %c0_2] : memref<16x32xbf16, #tpu.memory_space<vmem>>, vector<16x32xbf16>
    %cst = arith.constant dense<0.000000e+00> : vector<8x32xf32>
    %3 = tpu.matmul %1, %2, %cst {dimension_numbers = #tpu.dot_dimension_numbers<[1], [0], [0], [1], [0, 0, 1, 1], [], []>} : vector<8x16xbf16>, vector<16x32xbf16>, vector<8x32xf32> -> vector<8x32xf32>
    %c0_3 = arith.constant 0 : index
    %c0_4 = arith.constant 0 : index
    %4 = vector.load %arg3[%c0_3, %c0_4] : memref<1x32xf32, #tpu.memory_space<vmem>>, vector<1x32xf32>
    %5 = vector.broadcast %4 : vector<1x32xf32> to vector<8x32xf32>
    %6 = arith.addf %3, %5 : vector<8x32xf32>
    %cst_5 = arith.constant 0.000000e+00 : f32
    %7 = vector.broadcast %cst_5 : f32 to vector<8x32xf32>
    %8 = arith.cmpf ogt, %6, %7 : vector<8x32xf32>
    %cst_6 = arith.constant 0.00999999977 : f32
    %9 = vector.broadcast %cst_6 : f32 to vector<8x32xf32>
    %10 = arith.mulf %9, %6 : vector<8x32xf32>
    %11 = arith.select %8, %6, %10 : vector<8x32xi1>, vector<8x32xf32>
    %12 = arith.truncf %11 : vector<8x32xf32> to vector<8x32xbf16>
    %c0_7 = arith.constant 0 : index
    %c0_8 = arith.constant 0 : index
    %13 = vector.load %arg4[%c0_7, %c0_8] : memref<32x64xbf16, #tpu.memory_space<vmem>>, vector<32x64xbf16>
    %cst_9 = arith.constant dense<0.000000e+00> : vector<8x64xf32>
    %14 = tpu.matmul %12, %13, %cst_9 {dimension_numbers = #tpu.dot_dimension_numbers<[1], [0], [0], [1], [0, 0, 1, 1], [], []>} : vector<8x32xbf16>, vector<32x64xbf16>, vector<8x64xf32> -> vector<8x64xf32>
    %c0_10 = arith.constant 0 : index
    %c0_11 = arith.constant 0 : index
    %15 = vector.load %arg5[%c0_10, %c0_11] : memref<1x64xf32, #tpu.memory_space<vmem>>, vector<1x64xf32>
    %16 = vector.broadcast %15 : vector<1x64xf32> to vector<8x64xf32>
    %17 = arith.addf %14, %16 : vector<8x64xf32>
    %cst_12 = arith.constant 0.000000e+00 : f32
    %18 = vector.broadcast %cst_12 : f32 to vector<8x64xf32>
    %19 = arith.cmpf ogt, %17, %18 : vector<8x64xf32>
    %cst_13 = arith.constant 0.00999999977 : f32
    %20 = vector.broadcast %cst_13 : f32 to vector<8x64xf32>
    %21 = arith.mulf %20, %17 : vector<8x64xf32>
    %22 = arith.select %19, %17, %21 : vector<8x64xi1>, vector<8x64xf32>
    %23 = arith.truncf %22 : vector<8x64xf32> to vector<8x64xbf16>
    %c0_14 = arith.constant 0 : index
    %c0_15 = arith.constant 0 : index
    %24 = vector.load %arg6[%c0_14, %c0_15] : memref<64x32xbf16, #tpu.memory_space<vmem>>, vector<64x32xbf16>
    %cst_16 = arith.constant dense<0.000000e+00> : vector<8x32xf32>
    %25 = tpu.matmul %23, %24, %cst_16 {dimension_numbers = #tpu.dot_dimension_numbers<[1], [0], [0], [1], [0, 0, 1, 1], [], []>} : vector<8x64xbf16>, vector<64x32xbf16>, vector<8x32xf32> -> vector<8x32xf32>
    %c0_17 = arith.constant 0 : index
    %c0_18 = arith.constant 0 : index
    %26 = vector.load %arg7[%c0_17, %c0_18] : memref<32x32xbf16, #tpu.memory_space<vmem>>, vector<32x32xbf16>
    %cst_19 = arith.constant dense<0.000000e+00> : vector<8x32xf32>
    %27 = tpu.matmul %12, %26, %cst_19 {dimension_numbers = #tpu.dot_dimension_numbers<[1], [0], [0], [1], [0, 0, 1, 1], [], []>} : vector<8x32xbf16>, vector<32x32xbf16>, vector<8x32xf32> -> vector<8x32xf32>
    %28 = arith.addf %25, %27 : vector<8x32xf32>
    %c0_20 = arith.constant 0 : index
    %c0_21 = arith.constant 0 : index
    %29 = vector.load %arg8[%c0_20, %c0_21] : memref<1x32xf32, #tpu.memory_space<vmem>>, vector<1x32xf32>
    %30 = vector.broadcast %29 : vector<1x32xf32> to vector<8x32xf32>
    %31 = arith.addf %28, %30 : vector<8x32xf32>
    %cst_22 = arith.constant 0.000000e+00 : f32
    %32 = vector.broadcast %cst_22 : f32 to vector<8x32xf32>
    %33 = arith.cmpf ogt, %31, %32 : vector<8x32xf32>
    %cst_23 = arith.constant 0.00999999977 : f32
    %34 = vector.broadcast %cst_23 : f32 to vector<8x32xf32>
    %35 = arith.mulf %34, %31 : vector<8x32xf32>
    %36 = arith.select %33, %31, %35 : vector<8x32xi1>, vector<8x32xf32>
    %37 = tpu.concatenate %36, %22, %11 in 1 : vector<8x32xf32>, vector<8x64xf32>, vector<8x32xf32> -> vector<8x128xf32>
    %c0_24 = arith.constant 0 : index
    %c0_25 = arith.constant 0 : index
    %38 = vector.load %arg12[%c0_24, %c0_25] : memref<8x128xf32, #tpu.memory_space<vmem>>, vector<8x128xf32>
    tpu.vector_store %arg12[%c0_24, %c0_25], %37 {strides = array<i32>} : memref<8x128xf32, #tpu.memory_space<vmem>>, vector<8x128xf32>,
    %39 = arith.truncf %37 : vector<8x128xf32> to vector<8x128xbf16>
    %c0_26 = arith.constant 0 : index
    %c0_27 = arith.constant 0 : index
    %40 = vector.load %arg9[%c0_26, %c0_27] : memref<128x16xbf16, #tpu.memory_space<vmem>>, vector<128x16xbf16>
    %cst_28 = arith.constant dense<0.000000e+00> : vector<8x16xf32>
    %41 = tpu.matmul %39, %40, %cst_28 {dimension_numbers = #tpu.dot_dimension_numbers<[1], [0], [0], [1], [0, 0, 1, 1], [], []>} : vector<8x128xbf16>, vector<128x16xbf16>, vector<8x16xf32> -> vector<8x16xf32>
    %c0_29 = arith.constant 0 : index
    %c0_30 = arith.constant 0 : index
    %42 = vector.load %arg10[%c0_29, %c0_30] : memref<1x16xf32, #tpu.memory_space<vmem>>, vector<1x16xf32>
    %43 = vector.broadcast %42 : vector<1x16xf32> to vector<8x16xf32>
    %44 = arith.addf %41, %43 : vector<8x16xf32>
    %c0_31 = arith.constant 0 : index
    %c0_32 = arith.constant 0 : index
    %45 = vector.load %arg11[%c0_31, %c0_32] : memref<8x16xf32, #tpu.memory_space<vmem>>, vector<8x16xf32>
    tpu.vector_store %arg11[%c0_31, %c0_32], %44 {strides = array<i32>} : memref<8x16xf32, #tpu.memory_space<vmem>>, vector<8x16xf32>,
    return
  }
  func.func @transform_0(%arg0: i32) -> (i32, i32) {
    %c0_i32 = arith.constant 0 : i32
    %c0_i32_0 = arith.constant 0 : i32
    return %arg0, %c0_i32 : i32, i32
  }
  func.func @transform_1(%arg0: i32) -> (i32, i32) {
    %c0_i32 = arith.constant 0 : i32
    %c0_i32_0 = arith.constant 0 : i32
    %c0_i32_1 = arith.constant 0 : i32
    return %c0_i32, %c0_i32_0 : i32, i32
  }
  func.func @transform_2(%arg0: i32) -> (i32, i32) {
    %c0_i32 = arith.constant 0 : i32
    %c0_i32_0 = arith.constant 0 : i32
    %c0_i32_1 = arith.constant 0 : i32
    return %c0_i32, %c0_i32_0 : i32, i32
  }
  func.func @transform_3(%arg0: i32) -> (i32, i32) {
    %c0_i32 = arith.constant 0 : i32
    %c0_i32_0 = arith.constant 0 : i32
    %c0_i32_1 = arith.constant 0 : i32
    return %c0_i32, %c0_i32_0 : i32, i32
  }
  func.func @transform_4(%arg0: i32) -> (i32, i32) {
    %c0_i32 = arith.constant 0 : i32
    %c0_i32_0 = arith.constant 0 : i32
    %c0_i32_1 = arith.constant 0 : i32
    return %c0_i32, %c0_i32_0 : i32, i32
  }
  func.func @transform_5(%arg0: i32) -> (i32, i32) {
    %c0_i32 = arith.constant 0 : i32
    %c0_i32_0 = arith.constant 0 : i32
    %c0_i32_1 = arith.constant 0 : i32
    return %c0_i32, %c0_i32_0 : i32, i32
  }
  func.func @transform_6(%arg0: i32) -> (i32, i32) {
    %c0_i32 = arith.constant 0 : i32
    %c0_i32_0 = arith.constant 0 : i32
    %c0_i32_1 = arith.constant 0 : i32
    return %c0_i32, %c0_i32_0 : i32, i32
  }
  func.func @transform_7(%arg0: i32) -> (i32, i32) {
    %c0_i32 = arith.constant 0 : i32
    %c0_i32_0 = arith.constant 0 : i32
    %c0_i32_1 = arith.constant 0 : i32
    return %c0_i32, %c0_i32_0 : i32, i32
  }
  func.func @transform_8(%arg0: i32) -> (i32, i32) {
    %c0_i32 = arith.constant 0 : i32
    %c0_i32_0 = arith.constant 0 : i32
    %c0_i32_1 = arith.constant 0 : i32
    return %c0_i32, %c0_i32_0 : i32, i32
  }
  func.func @transform_9(%arg0: i32) -> (i32, i32) {
    %c0_i32 = arith.constant 0 : i32
    %c0_i32_0 = arith.constant 0 : i32
    %c0_i32_1 = arith.constant 0 : i32
    return %c0_i32, %c0_i32_0 : i32, i32
  }
  func.func @transform_10(%arg0: i32) -> (i32, i32) {
    %c0_i32 = arith.constant 0 : i32
    %c0_i32_0 = arith.constant 0 : i32
    return %arg0, %c0_i32 : i32, i32
  }
  func.func @transform_11(%arg0: i32) -> (i32, i32) {
    %c0_i32 = arith.constant 0 : i32
    %c0_i32_0 = arith.constant 0 : i32
    return %arg0, %c0_i32 : i32, i32
  }
}

</mosaic_0001>

<bundles_post_ra>
// kernel: tpu_custom_call.1
= control target key start
LH: loop header
LB: loop body
LE: loop exit
PB: predicated region body
PF: predicated region fallthrough
CT: control target
= control target key end

     0   :  { %17 = vsyncpa [#allocation3], 0  ;;  %v640_v1 = vmov 0.0   ;;  %vm57_vm0 = vcmask 130048   ;;  %vm641_vm1 = vmmov 0   ;;  %s810_s0 = inlined_call_operand.vmem [shape: f32[8,16], index: 0, kind: input, shape index: {}]   ;;  %s811_s1 = inlined_call_operand.vmem [shape: bf16[16,32], index: 1, kind: input, shape index: {}]   ;;  %s812_s2 = inlined_call_operand.vmem [shape: f32[1,32], index: 2, kind: input, shape index: {}]   ;;  %s813_s3 = inlined_call_operand.vmem [shape: bf16[32,64], index: 3, kind: input, shape index: {}]   ;;  %s814_s4 = inlined_call_operand.vmem [shape: f32[1,64], index: 4, kind: input, shape index: {}]   ;;  %s815_s5 = inlined_call_operand.vmem [shape: bf16[64,32], index: 5, kind: input, shape index: {}]   ;;  %s816_s6 = inlined_call_operand.vmem [shape: bf16[32,32], index: 6, kind: input, shape index: {}]   ;;  %s817_s7 = inlined_call_operand.vmem [shape: f32[1,32], index: 7, kind: input, shape index: {}]   ;;  %s818_s8 = inlined_call_operand.vmem [shape: bf16[128,16], index: 8, kind: input, shape index: {}]   ;;  %s819_s9 = inlined_call_operand.vmem [shape: f32[1,16], index: 9, kind: input, shape index: {}]   ;;  %s820_s10 = inlined_call_operand.hbm [shape: f32[8,16], index: 10, kind: output, shape index: {0}]   ;;  %s821_s11 = inlined_call_operand.hbm [shape: f32[8,128], index: 11, kind: output, shape index: {1}]  }
   0x1   :  { %v579_v0 = vld [vmem:[%s811_s1] sm:$0xff]   ;;  %519 = vmatprep.subr.bf16.mxu0 %v640_v1  ;;  %525 = vmatprep.subr.bf16.mxu1 %v640_v1 }
   0x2   :  { %v40_v2 = vld [vmem:[%s810_s0] sm:$0xff]  ;;  %520 = vmatpush3.bf16.msra.mxu0 %v579_v0  ;;  %521 = vmatprep.mubr.msk.bf16.mxu0 %vm641_vm1, %v640_v1 }
   0x3   :  { %v41_v3 = vpack.c.bf16 %v40_v2, %v40_v2  ;;  %529 = vmatprep.mubr.msk.bf16.mxu1 %vm641_vm1, %v640_v1  ;;  %553 = vmatprep.subr.bf16.mxu0 %v640_v1 }
   0x5   :  { %522 = vmatmul.mubr.msk.bf16.vlgmr.msra.gmra.mxu0 %vm57_vm0, %v41_v3 }
   0x6   :  { %569 = vmatprep.mubr.msk.bf16.mxu0 %vm641_vm1, %v640_v1 }
   0x7   :  { %18 = vsyncpa [#allocation5], 0  ;;  %v580_v4 = vld [vmem:[%s813_s3 + $0x8] sm:$0xff]   ;;  %v581_v5 = vld [vmem:[%s813_s3] sm:$0xff]   ;;  %vm128_vm3 = vcmask 261120   ;;  %vm264_vm5 = vcmask 523264  }
   0x8   :  { %526 = vmatpush3.bf16.msra.mxu1 %v580_v4  ;;  %v472_v6 = vld [vmem:[%s812_s2] ss:$0 sm:$0xff]  ;;  %v582_v13 = vld [vmem:[%s816_s6 + $0x8] sm:$0xff]   ;;  %v584_v17 = vld [vmem:[%s815_s5 + $0x18] sm:$0xff]   ;;  %s643_s22 = smov 96   ;;  %vm328_vm7 = vcmask 785408  }
   0x9   :  { %527 = vmatprep.subr.bf16.mxu1 %v640_v1  ;;  %v583_v16 = vld [vmem:[%s816_s6] sm:$0xff]   ;;  %v585_v18 = vld [vmem:[%s815_s5 + $0x10] sm:$0xff]   ;;  %v586_v19 = vld [vmem:[%s815_s5 + $0x8] sm:$0xff]  }
   0xa   :  { %v587_v20 = vld [vmem:[%s815_s5] sm:$0xff]   ;;  %v588_v21 = vld [vmem:[%s818_s8 + $0x38] sm:$0xff]   ;;  %v589_v23 = vld [vmem:[%s818_s8 + $0x30] sm:$0xff]  }
   0xb   :  { %v475_v22 = vld [vmem:[%s814_s4] ss:$0 sm:$0xff]  ;;  %554 = vmatpush3.bf16.msra.mxu0 %v588_v21  ;;  %v590_v27 = vld [vmem:[%s818_s8 + $0x28] sm:$0xff]   ;;  %s642_s4 = smov 32   ;;  %v592_v36 = vld [vmem:[%s818_s8 + $0x18] sm:$0xff]  }
   0xc   :  { %528 = vmatpush3.bf16.msra.mxu1 %v581_v5  ;;  %555 = vmatprep.subr.bf16.mxu0 %v640_v1  ;;  %v591_v33 = vld [vmem:[%s818_s8 + $0x20] sm:$0xff]   ;;  %v593_v39 = vld [vmem:[%s818_s8 + $0x10] sm:$0xff]   ;;  %v594_v40 = vld [vmem:[%s818_s8 + $0x8] sm:$0xff]  }
   0xd   :  { %533 = vmatprep.subr.bf16.mxu1 %v640_v1  ;;  %v595_v41 = vld [vmem:[%s818_s8] sm:$0xff]   ;;  %s644_s8 = smov [#allocation4]  }
   0xe   :  { %v487_v43 = vld [vmem:[%s817_s7] ss:$0 sm:$0xff]  ;;  %s460_s6 = sshll.u32 %s644_s8, 4  ;;  %s461_s6 = int_to_ptr.vmem [resolvable:$true] %s460_s6 }
   0xf   :  { %556 = vmatpush3.bf16.msra.mxu0 %v589_v23  ;;  %s596_s7 = scalar_lea.vmem %s461_s6, 128  ;;  %p601_p1 = scmp.lt.s32.totalorder %s461_s6, %s461_s6 }
  0x10   :  { %557 = vmatprep.subr.bf16.mxu0 %v640_v1  ;;  %p597_p0 = scmp.ne.s32.totalorder %s461_s6, %s596_s7  ;;  %p602_p2 = scmp.lt.s32.totalorder %s596_s7, %s596_s7 }
  0x12   :  { %p603_p3 = por %p602_p2, %p601_p1 }
  0x13   :  { %558 = vmatpush3.bf16.msra.mxu0 %v590_v27 }
  0x14   :  { %559 = vmatprep.subr.bf16.mxu0 %v640_v1  ;;  %p604_p4 = pnand %p603_p3, %p597_p0 }
  0x17   :  { %560 = vmatpush3.bf16.msra.mxu0 %v591_v33 }
  0x18   :  { %561 = vmatprep.subr.bf16.mxu0 %v640_v1 }
  0x1b   :  { %562 = vmatpush3.bf16.msra.mxu0 %v592_v36 }
  0x1c   :  { %563 = vmatprep.subr.bf16.mxu0 %v640_v1 }
  0x1f   :  { %564 = vmatpush3.bf16.msra.mxu0 %v593_v39 }
  0x20   :  { %565 = vmatprep.subr.bf16.mxu0 %v640_v1 }
  0x23   :  { %566 = vmatpush3.bf16.msra.mxu0 %v594_v40 }
  0x24   :  { %567 = vmatprep.subr.bf16.mxu0 %v640_v1 }
  0x27   :  { %568 = vmatpush3.bf16.msra.mxu0 %v595_v41 }
  0xc5   :  { %v95_v7 = vpop.f32.mrf.mxu0 }
  0xc6   :  { %v96_v8 = vadd.f32 %v472_v6, %v95_v7 }
  0xc7   :  { %v523_v9 = vpop.f32.mrf.mxu0 }
  0xc8   :  { %vm101_vm2 = vcmp.gt.f32.partialorder %v96_v8, 0.0  ;;  %v102_v10 = vmul.f32 0.01, %v96_v8 }
  0xc9   :  { %v98_v11 = vpop.f32.mrf.mxu0 }
  0xca   :  { %v103_v12 = vsel %vm101_vm2, %v96_v8, %v102_v10 }
  0xcb   :  { %v104_v14 = vpack.c.bf16 %v103_v12, %v103_v12  ;;  %v524_v15 = vpop.f32.mrf.mxu0 }
  0xcd   :  { %530 = vmatmul.mubr.msk.bf16.vlgmr.msra.gmra.mxu1 %vm128_vm3, %v104_v14 }
  0xce   :  { %534 = vmatpush3.bf16.msra.mxu1 %v582_v13  ;;  %537 = vmatprep.mubr.msk.bf16.mxu1 %vm641_vm1, %v640_v1 }
  0xcf   :  { %535 = vmatprep.subr.bf16.mxu1 %v640_v1 }
  0xd2   :  { %536 = vmatpush3.bf16.msra.mxu1 %v583_v16 }
  0xd3   :  { %541 = vmatprep.subr.bf16.mxu1 %v640_v1 }
  0xd5   :  { %538 = vmatmul.mubr.msk.bf16.vlgmr.msra.gmra.mxu1 %vm128_vm3, %v104_v14 }
  0xd6   :  { %542 = vmatpush3.bf16.msra.mxu1 %v584_v17  ;;  %549 = vmatprep.mubr.msk.bf16.mxu1 %vm641_vm1, %v640_v1 }
  0xd7   :  { %543 = vmatprep.subr.bf16.mxu1 %v640_v1 }
  0xda   :  { %544 = vmatpush3.bf16.msra.mxu1 %v585_v18 }
  0xdb   :  { %545 = vmatprep.subr.bf16.mxu1 %v640_v1 }
  0xde   :  { %546 = vmatpush3.bf16.msra.mxu1 %v586_v19 }
  0xdf   :  { %547 = vmatprep.subr.bf16.mxu1 %v640_v1 }
  0xe2   :  { %548 = vmatpush3.bf16.msra.mxu1 %v587_v20 }
 0x18d   :  { %v166_v24 = vpop.f32.mrf.mxu1 }
 0x18e   :  { %v167_v25 = vadd.f32 %v475_v22, %v166_v24 }
 0x18f   :  { %v531_v26 = vpop.f32.mrf.mxu1 }
 0x190   :  { %vm172_vm4 = vcmp.gt.f32.partialorder %v167_v25, 0.0  ;;  %v173_v28 = vmul.f32 0.01, %v167_v25 }
 0x191   :  { %v169_v29 = vpop.f32.mrf.mxu1 }
 0x192   :  { %v174_v30 = vsel %vm172_vm4, %v167_v25, %v173_v28 }
 0x193   :  { %320 = vrot.lane.b32.xlu0 %v174_v30, %s642_s4  ;;  %v175_v31 = vpack.c.bf16 %v174_v30, %v174_v30  ;;  %v532_v32 = vpop.f32.mrf.mxu1 }
 0x195   :  { %v234_v34 = vpop.f32.mrf.mxu1  ;;  %550 = vmatmul.mubr.msk.bf16.vlgmr.msra.gmra.mxu1 %vm264_vm5, %v175_v31 }
 0x197   :  { %324 = vrot.lane.b32.xlu0 %v103_v12, %s643_s22  ;;  %v539_v35 = vpop.f32.mrf.mxu1 }
 0x199   :  { %v237_v37 = vpop.f32.mrf.mxu1 }
 0x19b   :  { %v540_v38 = vpop.f32.mrf.mxu1 }
 0x205   :  { %v321_v45 = vpop.permute.xlu0 %320 }
 0x209   :  { %v325_v52 = vpop.permute.xlu0 %324 }
 0x255   :  { %v302_v42 = vpop.f32.mrf.mxu1 }
 0x256   :  { %v303_v44 = vadd.f32 %v302_v42, %v234_v34 }
 0x257   :  { %v551_v46 = vpop.f32.mrf.mxu1 }
 0x258   :  { %v315_v47 = vadd.f32 %v487_v43, %v303_v44 }
 0x259   :  { %v305_v48 = vpop.f32.mrf.mxu1 }
 0x25a   :  { %vm316_vm6 = vcmp.gt.f32.partialorder %v315_v47, 0.0  ;;  %v317_v49 = vmul.f32 0.01, %v315_v47 }
 0x25b   :  { %v552_v50 = vpop.f32.mrf.mxu1 }
 0x25c   :  { %v318_v51 = vsel %vm316_vm6, %v315_v47, %v317_v49 }
 0x25d   :  { %v327_v53 = vsel %vm128_vm3, %v318_v51, %v321_v45 }
 0x25e   :  { %v329_v54 = vsel %vm328_vm7, %v327_v53, %v325_v52 }
 0x25f   :  { %v331_v55 = vpack.c.bf16 %v329_v54, %v329_v54  ;;  %330 = vst [vmem:[#allocation4] sm:$0xff] %v329_v54 }
 0x261   :  { %570 = vmatmul.mubr.bf16.vlgmr.msra.gmra.mxu0 %v331_v55 }
 0x262   :  { %607 = shalt.err (!%p604_p4)
}
 0x263   :  { %463 = dma.vmem_to_hbm [thread:$0]  %s461_s6, 128, %s821_s11, [#allocation5]   ;;  %v488_v56 = vld [vmem:[%s819_s9] ss:$0 sm:$0xff] }
 0x264   :  { %s645_s16 = smov [#allocation2]  }
 0x265   :  { %s450_s17 = sshll.u32 %s645_s16, 4  ;;  %s451_s17 = int_to_ptr.vmem [resolvable:$true] %s450_s17 }
 0x266   :  { %s616_s18 = scalar_lea.vmem %s451_s17, 128  ;;  %p621_p6 = scmp.lt.s32.totalorder %s451_s17, %s451_s17 }
 0x267   :  { %p617_p5 = scmp.ne.s32.totalorder %s451_s17, %s616_s18  ;;  %p622_p7 = scmp.lt.s32.totalorder %s616_s18, %s616_s18 }
 0x269   :  { %p623_p8 = por %p622_p7, %p621_p6 }
 0x26b   :  { %p624_p9 = pnand %p623_p8, %p617_p5 }
 0x321   :  { %v437_v57 = vpop.f32.mrf.mxu0 }
 0x322   :  { %v438_v58 = vadd.f32 %v488_v56, %v437_v57 }
 0x323   :  { %v571_v59 = vpop.f32.mrf.mxu0 }
 0x324   :  { %443 = vst.msk [vmem:[#allocation2] sm:$0xff] %vm57_vm0, %v438_v58 }
 0x325   :  { %v440_v60 = vpop.f32.mrf.mxu0 }
 0x326   :  { %627 = shalt.err (!%p624_p9)
}
 0x327   :  { %453 = dma.vmem_to_hbm [thread:$0]  %s451_s17, 128, %s820_s10, [#allocation3]   ;;  %v572_v61 = vpop.f32.mrf.mxu0 }
 0x328   :  { %636 = dma.done.wait [#allocation3], 128  }
 0x329   :  { %637 = vsyncadd [#allocation3], 4294967168 }
 0x32a   :  { %638 = dma.done.wait [#allocation5], 128  }
 0x32b   :  { %639 = vsyncadd [#allocation5], 4294967168 }
 0x32c   :  { %470 = vsyncpa [#allocation3], 1 }
 0x32d   :  { %471 = vsyncpa [#allocation5], 1 }

</bundles_post_ra>
